<compile_context>
chip_gen: v7x
topology: tpu7x:2x2x1
jax: 0.10.0
libtpu: 0.0.40
codegen_flags: <defaults>
</compile_context>

<pallas_src>
import jax
import jax.numpy as jnp
import numpy as np
from jax.experimental import pallas as pl
from jax.experimental.pallas import tpu as pltpu


def _round_up(x, m):
    return ((x + m - 1) // m) * m


# --------------------------------------------------------------------------- #
# Kernel
# --------------------------------------------------------------------------- #
def _topic_cls_kernel(bow_ref, emb_ref, inv_ref, w_ref, b_ref, out_ref, acc_ref):
    """Grid = (B tiles, V tiles).  V (axis 1) is the reduction axis."""
    k = pl.program_id(1)

    @pl.when(k == 0)
    def _init():
        acc_ref[...] = jnp.zeros_like(acc_ref)

    # Sum-pool over this V tile: (tb, tv) bf16 @ (tv, D) bf16 -> f32 accumulate.
    acc_ref[...] += jnp.dot(bow_ref[...], emb_ref[...],
                            preferred_element_type=jnp.float32)

    @pl.when(k == pl.num_programs(1) - 1)
    def _finalize():
        # Exact mean: per-bag 1/len scale in f32 (VPU), then tiny classifier GEMM.
        pooled = acc_ref[...] * inv_ref[...]                       # (tb, D) * (tb, 1)
        out_ref[...] = (jnp.dot(pooled, w_ref[...],
                                preferred_element_type=jnp.float32)
                        + b_ref[...])


# --------------------------------------------------------------------------- #
# Tile selection (per TPU generation)
# --------------------------------------------------------------------------- #
def _pick_tiles(B, V, D, C_pad):
    try:
        kind = jax.devices()[0].device_kind.lower()
    except Exception:  # pragma: no cover - CPU interpret / unknown backend
        kind = ""

    if "v7" in kind:
        tv_cap, tb_cap = 8192, 512
        vmem_limit = 48 * 1024 * 1024       # 64 MiB physical per TC -> stay well under
        two_cores = True
    elif "v6" in kind:
        tv_cap, tb_cap = 8192, 512
        vmem_limit = 96 * 1024 * 1024       # 128 MiB physical
        two_cores = False
    elif "v5" in kind:
        tv_cap, tb_cap = 4096, 512
        vmem_limit = 64 * 1024 * 1024       # default scope is only 16 MiB -> raise it
        two_cores = False
    else:
        tv_cap, tb_cap = 4096, 256
        vmem_limit = 64 * 1024 * 1024
        two_cores = False

    # tb: multiple of 16 (bf16 packs 16 sublanes per vreg), big enough to amortize
    # per-step overhead and to avoid re-reading the embedding table too often.
    tb = min(tb_cap, _round_up(B, 16))
    if two_cores:
        # Guarantee >= 2 B tiles on v7x when B allows, so both TensorCores get work.
        half = _round_up(max(1, (B + 1) // 2), 16)
        tb = max(16, min(tb, half))

    # tv: reduction tile, multiple of 128, as large as the VMEM budget allows.
    tv = min(tv_cap, _round_up(V, 128))

    def vmem_bytes(tb_, tv_):
        bow = 2 * tb_ * tv_ * 2            # double-buffered bf16 bow tile
        emb = 2 * tv_ * D * 2              # double-buffered bf16 embedding tile
        inv = 2 * tb_ * 4
        w = 2 * D * C_pad * 4
        bias = 2 * C_pad * 4
        out = 2 * tb_ * C_pad * 4
        acc = tb_ * D * 4
        return bow + emb + inv + w + bias + out + acc

    budget = int(0.75 * vmem_limit)
    while vmem_bytes(tb, tv) > budget and tv > 512:
        tv //= 2
    while vmem_bytes(tb, tv) > budget and tb > 16:
        tb //= 2

    return tb, tv, vmem_limit


# --------------------------------------------------------------------------- #
# Wrapper
# --------------------------------------------------------------------------- #
def topic_classification_forward(text, offsets, emb_weight, fc_weight, fc_bias,
                                 *, tb=None, tv=None):
    """Pallas-backed equivalent of TopicClassificationModel.forward.

    text      : int32[N]   flat token ids
    offsets   : int32[B]   bag start offsets (sorted, starting at 0, <= N)
    emb_weight: f32[V, D]  EmbeddingBag weight
    fc_weight : f32[C, D]  Linear weight (PyTorch layout)
    fc_bias   : f32[C]     Linear bias
    returns   : f32[B, C]
    """
    N = int(text.shape[0])
    B = int(offsets.shape[0])
    V, D = map(int, emb_weight.shape)
    C = int(fc_weight.shape[0])

    # ---- tile / pad sizes (lane-dense output, MXU-friendly tiles) -----------
    C_pad = _round_up(C, 128)                     # lane-dense output & bias
    auto_tb, auto_tv, vmem_limit = _pick_tiles(B, V, D, C_pad)
    tb = auto_tb if tb is None else max(16, _round_up(int(tb), 16))
    tv = auto_tv if tv is None else max(128, _round_up(int(tv), 128))
    B_pad = _round_up(B, tb)
    V_pad = _round_up(V, tv)

    # ---- plain-JAX glue: bag-of-words + per-bag 1/len ------------------------
    positions = jnp.arange(N, dtype=jnp.int32)
    seg_id = jnp.searchsorted(offsets, positions, side="right") - 1   # (N,) which bag
    # Scatter-add directly in bf16 (counts <= 256 are exact in bf16).
    bow = jnp.zeros((B_pad, V_pad), jnp.bfloat16).at[seg_id, text].add(
        jnp.bfloat16(1.0))

    ends = jnp.concatenate([offsets[1:], jnp.array([N], jnp.int32)])
    # Empty bag: pooled = 0, output row = fc_bias (same as PyTorch EmbeddingBag(mean)+Linear).
    lengths = jnp.maximum(ends - offsets, 1).astype(jnp.float32)
    inv_len = jnp.ones((B_pad,), jnp.float32).at[:B].set(1.0 / lengths)
    inv_len = inv_len.reshape(B_pad, 1)

    emb_pad = jnp.zeros((V_pad, D), jnp.bfloat16).at[:V, :].set(
        emb_weight.astype(jnp.bfloat16))
    w_t_pad = jnp.zeros((D, C_pad), jnp.float32).at[:, :C].set(
        fc_weight.T.astype(jnp.float32))
    bias_pad = jnp.zeros((1, C_pad), jnp.float32).at[0, :C].set(
        fc_bias.astype(jnp.float32))

    grid = (B_pad // tb, V_pad // tv)
    num_b_tiles = grid[0]

    # Advisory cost hint: dominant traffic is bow once + embedding table per B tile.
    bytes_accessed = (B_pad * V_pad * 2                      # bow (bf16)
                      + num_b_tiles * V_pad * D * 2          # embedding table per B tile
                      + B_pad * C_pad * 4                    # output
                      + D * C_pad * 4 + C_pad * 4 + B_pad * 4)
    flops = 2 * B_pad * V_pad * D + 2 * B_pad * D * C_pad
    cost = pl.CostEstimate(flops=int(flops), transcendentals=0,
                           bytes_accessed=int(bytes_accessed))

    out = pl.pallas_call(
        _topic_cls_kernel,
        out_shape=jax.ShapeDtypeStruct((B_pad, C_pad), jnp.float32),
        grid_spec=pltpu.PrefetchScalarGridSpec(
            num_scalar_prefetch=0,
            grid=grid,
            in_specs=[
                pl.BlockSpec((tb, tv),    lambda i, k: (i, k)),   # bow tile
                pl.BlockSpec((tv, D),     lambda i, k: (k, 0)),   # embedding tile
                pl.BlockSpec((tb, 1),     lambda i, k: (i, 0)),   # 1/len per bag
                pl.BlockSpec((D, C_pad),  lambda i, k: (0, 0)),   # fc weight^T (padded)
                pl.BlockSpec((1, C_pad),  lambda i, k: (0, 0)),   # fc bias (padded)
            ],
            out_specs=pl.BlockSpec((tb, C_pad), lambda i, k: (i, 0)),
            scratch_shapes=[pltpu.VMEM((tb, D), jnp.float32)],    # sum-pool accumulator
        ),
        compiler_params=pltpu.CompilerParams(
            dimension_semantics=("parallel", "arbitrary"),
            vmem_limit_bytes=vmem_limit),
        cost_estimate=cost,
    )(bow, emb_pad, inv_len, w_t_pad, bias_pad)

    return out[:B, :C]


# --------------------------------------------------------------------------- #
# Reference + test
# --------------------------------------------------------------------------- #
def _reference_forward(text, offsets, emb_weight, fc_weight, fc_bias):
    """Pure-numpy reference matching PyTorch EmbeddingBag(mean) + Linear (f32)."""
    text = np.asarray(text)
    offsets = np.asarray(offsets)
    N = text.shape[0]
    B = offsets.shape[0]
    ends = np.concatenate([offsets[1:], [N]])
    pooled = np.zeros((B, emb_weight.shape[1]), np.float32)
    for b in range(B):
        toks = text[offsets[b]:ends[b]]
        if len(toks) > 0:
            pooled[b] = np.asarray(emb_weight)[toks].mean(axis=0)
    return pooled @ np.asarray(fc_weight).T + np.asarray(fc_bias)


if __name__ == "__main__":
    initrange = 0.5
    key = jax.random.PRNGKey(0)

    # ---- Test 1: small, deterministic synthetic setup (mirrors __init__ shapes) ----
    vocab_size, embed_dim, num_class = 48, 32, 3
    k_emb, k_fcw, k_txt, k2_emb, k2_fcw, k2_txt = jax.random.split(key, 6)

    emb_weight = jax.random.uniform(
        k_emb, (vocab_size, embed_dim), jnp.float32, -initrange, initrange)
    fc_weight = jax.random.uniform(
        k_fcw, (num_class, embed_dim), jnp.float32, -initrange, initrange)
    fc_bias = jnp.zeros((num_class,), jnp.float32)

    # Ragged bags: lengths 5, 3, 6, 2  -> N = 16 tokens total, B = 4 bags.
    lengths = [5, 3, 6, 2]
    N = sum(lengths)
    text = jax.random.randint(k_txt, (N,), 0, vocab_size, dtype=jnp.int32)
    offsets = jnp.array(np.cumsum([0] + lengths[:-1]), dtype=jnp.int32)

    out = topic_classification_forward(text, offsets, emb_weight, fc_weight, fc_bias)
    out = jax.block_until_ready(out)
    ref = _reference_forward(text, offsets, emb_weight, fc_weight, fc_bias)
    # bf16 embedding operand on the MXU -> small, bounded deviation from f32 reference.
    np.testing.assert_allclose(np.asarray(out), ref, rtol=2e-2, atol=2e-2)

    # ---- Test 2: forces multiple V-reduction steps (exercises acc init/finalize) ----
    vocab2, dim2, cls2 = 300, 32, 3
    emb2 = jax.random.uniform(k2_emb, (vocab2, dim2), jnp.float32, -initrange, initrange)
    fcw2 = jax.random.uniform(k2_fcw, (cls2, dim2), jnp.float32, -initrange, initrange)
    fcb2 = jnp.zeros((cls2,), jnp.float32)
    lens2 = [7, 1, 4, 9, 3, 6]
    N2 = sum(lens2)
    text2 = jax.random.randint(k2_txt, (N2,), 0, vocab2, dtype=jnp.int32)
    offsets2 = jnp.array(np.cumsum([0] + lens2[:-1]), dtype=jnp.int32)

    out2 = topic_classification_forward(text2, offsets2, emb2, fcw2, fcb2,
                                        tb=16, tv=128)   # 3 reduction steps
    out2 = jax.block_until_ready(out2)
    ref2 = _reference_forward(text2, offsets2, emb2, fcw2, fcb2)
    np.testing.assert_allclose(np.asarray(out2), ref2, rtol=2e-2, atol=2e-2)

    print("KERNEL_OK")
</pallas_src>

<mosaic_0001>
module attributes {stable_mosaic.version = 11 : i64} {
  func.func @_topic_cls_kernel(%arg0: i32, %arg1: i32, %arg2: memref<16x128xbf16, #tpu.memory_space<vmem>>, %arg3: memref<128x32xbf16, #tpu.memory_space<vmem>>, %arg4: memref<16x1xf32, #tpu.memory_space<vmem>>, %arg5: memref<32x128xf32, #tpu.memory_space<vmem>>, %arg6: memref<1x128xf32, #tpu.memory_space<vmem>>, %arg7: memref<16x128xf32, #tpu.memory_space<vmem>>, %arg8: memref<16x32xf32, #tpu.memory_space<vmem>>) attributes {dimension_semantics = [#tpu.dimension_semantics<parallel>, #tpu.dimension_semantics<arbitrary>], iteration_bounds = array<i64: 1, 1>, scalar_prefetch = 0 : i64, scratch_operands = 1 : i64, tpu.core_type = #tpu.core_type<tc>, window_params = [{transform_indices = @transform_0, window_bounds = array<i64: 16, 128>}, {transform_indices = @transform_1, window_bounds = array<i64: 128, 32>}, {transform_indices = @transform_2, window_bounds = array<i64: 16, 1>}, {pipeline_mode = #tpu.pipeline_mode<synchronous>, transform_indices = @transform_3, window_bounds = array<i64: 32, 128>}, {pipeline_mode = #tpu.pipeline_mode<synchronous>, transform_indices = @transform_4, window_bounds = array<i64: 1, 128>}, {transform_indices = @transform_5, window_bounds = array<i64: 16, 128>}]} {
    %c0_i32 = arith.constant 0 : i32
    %0 = arith.cmpi eq, %arg1, %c0_i32 : i32
    %1 = arith.extui %0 : i1 to i32
    %c0_i32_0 = arith.constant 0 : i32
    %2 = arith.cmpi ne, %1, %c0_i32_0 : i32
    scf.if %2 {
      %cst_10 = arith.constant 0.000000e+00 : f32
      %12 = vector.broadcast %cst_10 : f32 to vector<16x32xf32>
      %c0_11 = arith.constant 0 : index
      %c0_12 = arith.constant 0 : index
      %13 = vector.load %arg8[%c0_11, %c0_12] : memref<16x32xf32, #tpu.memory_space<vmem>>, vector<16x32xf32>
      tpu.vector_store %arg8[%c0_11, %c0_12], %12 {strides = array<i32>} : memref<16x32xf32, #tpu.memory_space<vmem>>, vector<16x32xf32>,
    } else {
    }
    %c0 = arith.constant 0 : index
    %c0_1 = arith.constant 0 : index
    %3 = vector.load %arg8[%c0, %c0_1] : memref<16x32xf32, #tpu.memory_space<vmem>>, vector<16x32xf32>
    %c0_2 = arith.constant 0 : index
    %c0_3 = arith.constant 0 : index
    %4 = vector.load %arg2[%c0_2, %c0_3] : memref<16x128xbf16, #tpu.memory_space<vmem>>, vector<16x128xbf16>
    %c0_4 = arith.constant 0 : index
    %c0_5 = arith.constant 0 : index
    %5 = vector.load %arg3[%c0_4, %c0_5] : memref<128x32xbf16, #tpu.memory_space<vmem>>, vector<128x32xbf16>
    %cst = arith.constant dense<0.000000e+00> : vector<16x32xf32>
    %6 = tpu.matmul %4, %5, %cst {dimension_numbers = #tpu.dot_dimension_numbers<[1], [0], [0], [1], [0, 0, 1, 1], [], []>} : vector<16x128xbf16>, vector<128x32xbf16>, vector<16x32xf32> -> vector<16x32xf32>
    %7 = arith.addf %3, %6 : vector<16x32xf32>
    %c0_6 = arith.constant 0 : index
    %c0_7 = arith.constant 0 : index
    %8 = vector.load %arg8[%c0_6, %c0_7] : memref<16x32xf32, #tpu.memory_space<vmem>>, vector<16x32xf32>
    tpu.vector_store %arg8[%c0_6, %c0_7], %7 {strides = array<i32>} : memref<16x32xf32, #tpu.memory_space<vmem>>, vector<16x32xf32>,
    %c0_i32_8 = arith.constant 0 : i32
    %9 = arith.cmpi eq, %arg1, %c0_i32_8 : i32
    %10 = arith.extui %9 : i1 to i32
    %c0_i32_9 = arith.constant 0 : i32
    %11 = arith.cmpi ne, %10, %c0_i32_9 : i32
    scf.if %11 {
      %c0_10 = arith.constant 0 : index
      %c0_11 = arith.constant 0 : index
      %12 = vector.load %arg8[%c0_10, %c0_11] : memref<16x32xf32, #tpu.memory_space<vmem>>, vector<16x32xf32>
      %c0_12 = arith.constant 0 : index
      %c0_13 = arith.constant 0 : index
      %13 = vector.load %arg4[%c0_12, %c0_13] : memref<16x1xf32, #tpu.memory_space<vmem>>, vector<16x1xf32>
      %14 = vector.broadcast %13 : vector<16x1xf32> to vector<16x32xf32>
      %15 = arith.mulf %12, %14 : vector<16x32xf32>
      %c0_14 = arith.constant 0 : index
      %c0_15 = arith.constant 0 : index
      %16 = vector.load %arg5[%c0_14, %c0_15] : memref<32x128xf32, #tpu.memory_space<vmem>>, vector<32x128xf32>
      %cst_16 = arith.constant dense<0.000000e+00> : vector<16x128xf32>
      %17 = tpu.matmul %15, %16, %cst_16 {dimension_numbers = #tpu.dot_dimension_numbers<[1], [0], [0], [1], [0, 0, 1, 1], [], []>} : vector<16x32xf32>, vector<32x128xf32>, vector<16x128xf32> -> vector<16x128xf32>
      %c0_17 = arith.constant 0 : index
      %c0_18 = arith.constant 0 : index
      %18 = vector.load %arg6[%c0_17, %c0_18] : memref<1x128xf32, #tpu.memory_space<vmem>>, vector<1x128xf32>
      %19 = vector.broadcast %18 : vector<1x128xf32> to vector<16x128xf32>
      %20 = arith.addf %17, %19 : vector<16x128xf32>
      %c0_19 = arith.constant 0 : index
      %c0_20 = arith.constant 0 : index
      %21 = vector.load %arg7[%c0_19, %c0_20] : memref<16x128xf32, #tpu.memory_space<vmem>>, vector<16x128xf32>
      tpu.vector_store %arg7[%c0_19, %c0_20], %20 {strides = array<i32>} : memref<16x128xf32, #tpu.memory_space<vmem>>, vector<16x128xf32>,
    } else {
    }
    return
  }
  func.func @transform_0(%arg0: i32, %arg1: i32) -> (i32, i32) {
    %c0_i32 = arith.constant 0 : i32
    return %arg0, %arg1 : i32, i32
  }
  func.func @transform_1(%arg0: i32, %arg1: i32) -> (i32, i32) {
    %c0_i32 = arith.constant 0 : i32
    %c0_i32_0 = arith.constant 0 : i32
    return %arg1, %c0_i32 : i32, i32
  }
  func.func @transform_2(%arg0: i32, %arg1: i32) -> (i32, i32) {
    %c0_i32 = arith.constant 0 : i32
    %c0_i32_0 = arith.constant 0 : i32
    return %arg0, %c0_i32 : i32, i32
  }
  func.func @transform_3(%arg0: i32, %arg1: i32) -> (i32, i32) {
    %c0_i32 = arith.constant 0 : i32
    %c0_i32_0 = arith.constant 0 : i32
    %c0_i32_1 = arith.constant 0 : i32
    return %c0_i32, %c0_i32_0 : i32, i32
  }
  func.func @transform_4(%arg0: i32, %arg1: i32) -> (i32, i32) {
    %c0_i32 = arith.constant 0 : i32
    %c0_i32_0 = arith.constant 0 : i32
    %c0_i32_1 = arith.constant 0 : i32
    return %c0_i32, %c0_i32_0 : i32, i32
  }
  func.func @transform_5(%arg0: i32, %arg1: i32) -> (i32, i32) {
    %c0_i32 = arith.constant 0 : i32
    %c0_i32_0 = arith.constant 0 : i32
    return %arg0, %c0_i32 : i32, i32
  }
}

</mosaic_0001>

<bundles_post_ra>
// kernel: tpu_custom_call.1
= control target key start
LH: loop header
LB: loop body
LE: loop exit
PB: predicated region body
PF: predicated region fallthrough
CT: control target
= control target key end

     0   :  { %10 = vsyncpa [#allocation4], 0  ;;  %s712_s0 = inlined_call_operand.hbm [shape: bf16[16,128], index: 0, kind: input, shape index: {}]   ;;  %s713_s1 = inlined_call_operand.hbm [shape: bf16[128,32], index: 1, kind: input, shape index: {}]   ;;  %s714_s2 = inlined_call_operand.hbm [shape: f32[16,1], index: 2, kind: input, shape index: {}]   ;;  %s715_s3 = inlined_call_operand.hbm [shape: f32[32,128], index: 3, kind: input, shape index: {}]   ;;  %s716_s4 = inlined_call_operand.hbm [shape: f32[1,128], index: 4, kind: input, shape index: {}]   ;;  %s717_s5 = inlined_call_operand.hbm [shape: f32[16,128], index: 5, kind: output, shape index: {}]  }
   0x1   :  { %11 = vsyncpa [#allocation7], 0 }
   0x2   :  { %12 = vsyncpa [#allocation10], 0 }
   0x3   :  { %13 = vsyncpa [#allocation5], 0  ;;  %s576_s18 = smov [#allocation6]   ;;  %s436_s22 = scalar_lea.hbm %s713_s1, 1024 }
   0x4   :  { %s31_s19 = sshll.u32 %s576_s18, 4  ;;  %p437_p0 = scmp.ne.s32.totalorder %s713_s1, %s436_s22  ;;  %s32_s19 = int_to_ptr.vmem [resolvable:$true] %s31_s19 }
   0x5   :  { %p440_p1 = scmp.lt.u32.totalorder %s436_s22, %s713_s1 }
   0x7   :  { %p442_p2 = pnand %p440_p1, %p437_p0 }
   0x9   :  { %445 = shalt.err (!%p442_p2)
}
   0xa   :  { %s446_s27 = scalar_lea.vmem %s32_s19, 1024  ;;  %p451_p4 = scmp.lt.s32.totalorder %s32_s19, %s32_s19 }
   0xb   :  { %p447_p3 = scmp.ne.s32.totalorder %s32_s19, %s446_s27  ;;  %p452_p5 = scmp.lt.s32.totalorder %s446_s27, %s446_s27 }
   0xd   :  { %p453_p6 = por %p452_p5, %p451_p4 }
   0xf   :  { %p454_p7 = pnand %p453_p6, %p447_p3 }
  0x11   :  { %457 = shalt.err (!%p454_p7)
}
  0x12   :  { %s577_s28 = smov 64   ;;  %s578_s29 = smov 4  }
  0x13   :  { %37 = dma.hbm_to_vmem [thread:$0]  %s713_s1, 1024, %s32_s19, [#allocation7], %s577_s28, %s577_s28, %s578_s29  }
  0x14   :  { %s579_s7 = smov [#allocation9]   ;;  %s580_s9 = smov [#allocation3]  }
  0x15   :  { %s55_s8 = sshll.u32 %s579_s7, 4  ;;  %s19_s10 = sshll.u32 %s580_s9, 4  ;;  %s56_s8 = int_to_ptr.vmem [resolvable:$true] %s55_s8  ;;  %s20_s10 = int_to_ptr.vmem [resolvable:$true] %s19_s10 }
  0x16   :  { %s458_s13 = scalar_lea.hbm %s715_s3, 512 }
  0x17   :  { %p459_p8 = scmp.ne.s32.totalorder %s715_s3, %s458_s13  ;;  %p462_p9 = scmp.lt.u32.totalorder %s458_s13, %s715_s3 }
  0x19   :  { %p464_p10 = pnand %p462_p9, %p459_p8 }
  0x1b   :  { %467 = shalt.err (!%p464_p10)
}
  0x1c   :  { %s468_s1 = scalar_lea.vmem %s56_s8, 512  ;;  %p473_p12 = scmp.lt.s32.totalorder %s56_s8, %s56_s8 }
  0x1d   :  { %p469_p11 = scmp.ne.s32.totalorder %s56_s8, %s468_s1  ;;  %p474_p13 = scmp.lt.s32.totalorder %s468_s1, %s468_s1 }
  0x1f   :  { %p475_p0 = por %p474_p13, %p473_p12 }
  0x21   :  { %p476_p1 = pnand %p475_p0, %p469_p11 }
  0x23   :  { %479 = shalt.err (!%p476_p1)
}
  0x24   :  { %s581_s18 = smov 128   ;;  %s582_s19 = smov 8  }
  0x25   :  { %61 = dma.hbm_to_vmem [thread:$0]  %s715_s3, 512, %s56_s8, [#allocation10], %s581_s18, %s581_s18, %s582_s19  }
  0x26   :  { %s480_s24 = scalar_lea.hbm %s712_s0, 128 }
  0x27   :  { %p481_p2 = scmp.ne.s32.totalorder %s712_s0, %s480_s24  ;;  %p484_p3 = scmp.lt.u32.totalorder %s480_s24, %s712_s0 }
  0x29   :  { %p486_p4 = pnand %p484_p3, %p481_p2 }
  0x2b   :  { %489 = shalt.err (!%p486_p4)
}
  0x2c   :  { %s490_s6 = scalar_lea.vmem %s20_s10, 128  ;;  %p495_p6 = scmp.lt.s32.totalorder %s20_s10, %s20_s10 }
  0x2d   :  { %p491_p5 = scmp.ne.s32.totalorder %s20_s10, %s490_s6  ;;  %p496_p7 = scmp.lt.s32.totalorder %s490_s6, %s490_s6 }
  0x2f   :  { %p497_p8 = por %p496_p7, %p495_p6 }
  0x31   :  { %p498_p9 = pnand %p497_p8, %p491_p5 }
  0x33   :  { %501 = shalt.err (!%p498_p9)
}
  0x34   :  { %25 = dma.hbm_to_vmem [thread:$0]  %s712_s0, 128, %s20_s10, [#allocation4], %s577_s28, %s577_s28, %s578_s29  }
  0x35   :  { %s583_s8 = smov [#allocation8]   ;;  %s584_s11 = smov [#allocation11]  }
  0x36   :  { %s43_s9 = sshll.u32 %s583_s8, 4  ;;  %s68_s12 = sshll.u32 %s584_s11, 4  ;;  %s44_s9 = int_to_ptr.vmem [resolvable:$true] %s43_s9  ;;  %s69_s12 = int_to_ptr.vmem [resolvable:$true] %s68_s12 }
  0x37   :  { %s502_s15 = scalar_lea.hbm %s714_s2, 256 }
  0x38   :  { %p503_p10 = scmp.ne.s32.totalorder %s714_s2, %s502_s15  ;;  %p506_p11 = scmp.lt.u32.totalorder %s502_s15, %s714_s2 }
  0x3a   :  { %p508_p12 = pnand %p506_p11, %p503_p10 }
  0x3c   :  { %511 = shalt.err (!%p508_p12)
}
  0x3d   :  { %s512_s0 = scalar_lea.vmem %s44_s9, 256  ;;  %p517_p0 = scmp.lt.s32.totalorder %s44_s9, %s44_s9 }
  0x3e   :  { %p513_p13 = scmp.ne.s32.totalorder %s44_s9, %s512_s0  ;;  %p518_p1 = scmp.lt.s32.totalorder %s512_s0, %s512_s0 }
  0x40   :  { %p519_p2 = por %p518_p1, %p517_p0 }
  0x42   :  { %p520_p3 = pnand %p519_p2, %p513_p13 }
  0x44   :  { %523 = shalt.err (!%p520_p3)
}
  0x45   :  { %49 = dma.hbm_to_vmem [thread:$0]  %s714_s2, 256, %s44_s9, [#allocation7], %s581_s18, %s581_s18, %s582_s19  }
  0x46   :  { %s524_s22 = scalar_lea.hbm %s716_s4, 16 }
  0x47   :  { %p525_p4 = scmp.ne.s32.totalorder %s716_s4, %s524_s22  ;;  %p528_p5 = scmp.lt.u32.totalorder %s524_s22, %s716_s4 }
  0x49   :  { %p530_p6 = pnand %p528_p5, %p525_p4 }
  0x4b   :  { %533 = shalt.err (!%p530_p6)
}
  0x4c   :  { %s534_s27 = scalar_lea.vmem %s69_s12, 16  ;;  %s538_s30 = scalar_lea.vmem %s69_s12, 32 }
  0x4d   :  { %p535_p7 = scmp.ne.s32.totalorder %s69_s12, %s534_s27  ;;  %p539_p8 = scmp.lt.s32.totalorder %s69_s12, %s69_s12 }
  0x4e   :  { %p540_p9 = scmp.lt.s32.totalorder %s538_s30, %s534_s27 }
  0x50   :  { %p541_p10 = por %p540_p9, %p539_p8 }
  0x52   :  { %p542_p11 = pnand %p541_p10, %p535_p7 }
  0x54   :  { %545 = shalt.err (!%p542_p11)
}
  0x55   :  { %71 = dma.hbm_to_vmem [thread:$0]  %s716_s4, 16, %s69_s12, [#allocation10]  }
  0x56   :  { %568 = dma.done.wait [#allocation4], 128  }
  0x57   :  { %569 = vsyncadd [#allocation4], 4294967168 }
  0x58   :  { %570 = dma.done.wait [#allocation7], 1280  }
  0x59   :  { %571 = vsyncadd [#allocation7], 4294966016 }
  0x5a   :  { %572 = dma.done.wait [#allocation10], 528  }
  0x5b   :  { %573 = vsyncadd [#allocation10], 4294966768  ;;  %vm92_vm0 = vcmask 261120   ;;  %v585_v0 = vmov 0.0   ;;  %vm586_vm1 = vmmov 0   ;;  %v587_v1 = vmov 0  }
  0x5c   :  { %374 = vmatprep.subr.bf16.mxu0 %v585_v0  ;;  %390 = vmatprep.mubr.msk.bf16.mxu0 %vm586_vm1, %v585_v0  ;;  %93 = vst.msk [vmem:[#allocation2] sm:$0xff] %vm92_vm0, %v585_v0  ;;  %94 = vst.msk [vmem:[#allocation2 + $0x8] sm:$0xff] %vm92_vm0, %v585_v0  ;;  %v427_v2 = vld [vmem:[#allocation6] sm:$0xff]   ;;  %v428_v3 = vld [vmem:[#allocation6 + $0x8] sm:$0xff]   ;;  %s588_s4 = smov [#allocation12]  }
  0x5d   :  { %426 = vset.pattern.permute.xlu0 %v587_v1  ;;  %375 = vmatpush3.bf16.msra.mxu0 %v427_v2  ;;  %v429_v4 = vld [vmem:[#allocation6 + $0x10] sm:$0xff]   ;;  %v220_v5 = vld [vmem:[#allocation8] sm:$0xff]  ;;  %v430_v6 = vld [vmem:[#allocation6 + $0x18] sm:$0xff]   ;;  %s333_s3 = sshll.u32 %s588_s4, 4  ;;  %s334_s3 = int_to_ptr.vmem [resolvable:$true] %s333_s3 }
  0x5e   :  { %376 = vmatprep.subr.bf16.mxu0 %v585_v0  ;;  %224 = vperm.xlu0 %426, %v220_v5   ;;  %v221_v7 = vld [vmem:[#allocation8 + $0x8] sm:$0xff]  ;;  %v431_v8 = vld [vmem:[#allocation6 + $0x20] sm:$0xff]   ;;  %v433_v10 = vld [vmem:[#allocation6 + $0x30] sm:$0xff]   ;;  %s546_s7 = scalar_lea.vmem %s334_s3, 256  ;;  %p551_p13 = scmp.lt.s32.totalorder %s334_s3, %s334_s3 }
  0x5f   :  { %v432_v9 = vld [vmem:[#allocation6 + $0x28] sm:$0xff]   ;;  %v434_v11 = vld [vmem:[#allocation6 + $0x38] sm:$0xff]   ;;  %v234_v13 = vld [vmem:[#allocation9] sm:$0xff]  ;;  %p547_p12 = scmp.ne.s32.totalorder %s334_s3, %s546_s7  ;;  %p552_p0 = scmp.lt.s32.totalorder %s546_s7, %s546_s7 }
  0x60   :  { %v435_v12 = vld [vmem:[#allocation3] sm:$0xff]   ;;  %v236_v16 = vld [vmem:[#allocation9 + $0x10] sm:$0xff]  ;;  %v237_v17 = vld [vmem:[#allocation9 + $0x18] sm:$0xff] }
  0x61   :  { %377 = vmatpush3.bf16.msra.mxu0 %v428_v3  ;;  %v235_v14 = vld [vmem:[#allocation9 + $0x8] sm:$0xff]  ;;  %v409_v18 = vpack.c.bf16 %v237_v17, %v236_v16  ;;  %v356_v33 = vld [vmem:[#allocation11] ss:$0 sm:$0xff]  ;;  %p553_p1 = por %p552_p0, %p551_p13 }
  0x62   :  { %378 = vmatprep.subr.bf16.mxu0 %v585_v0  ;;  %229 = vperm.xlu0 %426, %v221_v7   ;;  %v405_v15 = vpack.c.bf16 %v235_v14, %v234_v13 }
  0x63   :  { %v95_v19 = vld [vmem:[#allocation2] sm:$0xff]  ;;  %v96_v21 = vld [vmem:[#allocation2 + $0x8] sm:$0xff]  ;;  %p554_p2 = pnand %p553_p1, %p547_p12 }
  0x64   :  { %406 = vmatprep.subr.bf16.mxu1 %v405_v15 }
  0x65   :  { %379 = vmatpush3.bf16.msra.mxu0 %v429_v4  ;;  %408 = vmatpush3.bf16.msra.mxu1 %v405_v15 }
  0x66   :  { %380 = vmatprep.subr.bf16.mxu0 %v585_v0  ;;  %410 = vmatprep.subr.bf16.mxu1 %v409_v18 }
  0x69   :  { %381 = vmatpush3.bf16.msra.mxu0 %v430_v6  ;;  %412 = vmatpush3.bf16.msra.mxu1 %v409_v18 }
  0x6a   :  { %382 = vmatprep.subr.bf16.mxu0 %v585_v0 }
  0x6d   :  { %383 = vmatpush3.bf16.msra.mxu0 %v431_v8 }
  0x6e   :  { %384 = vmatprep.subr.bf16.mxu0 %v585_v0 }
  0x71   :  { %385 = vmatpush3.bf16.msra.mxu0 %v432_v9 }
  0x72   :  { %386 = vmatprep.subr.bf16.mxu0 %v585_v0 }
  0x75   :  { %387 = vmatpush3.bf16.msra.mxu0 %v433_v10 }
  0x76   :  { %388 = vmatprep.subr.bf16.mxu0 %v585_v0 }
  0x79   :  { %389 = vmatpush3.bf16.msra.mxu0 %v434_v11 }
  0x7c   :  { %391 = vmatmul.mubr.bf16.vlgmr.msra.gmra.mrb[0].mxu0 %v435_v12 }
  0xdd   :  { %v225_v27 = vpop.permute.xlu0 %224 }
  0xe1   :  { %v230_v30 = vpop.permute.xlu0 %229 }
 0x14f   :  { %v203_v20 = vpop.f32.mrb[0].mxu0 }
 0x150   :  { %v210_v22 = vadd.f32 %v203_v20, %v95_v19  ;;  %v392_v23 = vpop.f32.mrb[1].mxu0 }
 0x151   :  { %v206_v24 = vpop.f32.mrb[2].mxu0 }
 0x152   :  { %213 = vst.msk [vmem:[#allocation2] sm:$0xff] %vm92_vm0, %v210_v22  ;;  %v211_v25 = vadd.f32 %v206_v24, %v96_v21  ;;  %v393_v26 = vpop.f32.mrb[3].mxu0 }
 0x154   :  { %214 = vst.msk [vmem:[#allocation2 + $0x8] sm:$0xff] %vm92_vm0, %v211_v25 }
 0x159   :  { %v218_v28 = vld [vmem:[#allocation2] sm:$0xff] }
 0x15a   :  { %v232_v29 = vmul.f32 %v225_v27, %v218_v28 }
 0x15b   :  { %v219_v31 = vld [vmem:[#allocation2 + $0x8] sm:$0xff] }
 0x15c   :  { %v233_v32 = vmul.f32 %v230_v30, %v219_v31  ;;  %402 = vmatprep.mubr.msk.f32.mxu1 %vm92_vm0, %v232_v29 }
 0x15e   :  { %403 = vmatmul.mubr.msk.f32.vlgmr.msra.gmra.mrb[0].mxu1 %vm92_vm0, %v233_v32 }
 0x231   :  { %v404_v34 = vpop.f32.mrb[0].mxu1 }
 0x232   :  { %v323_v35 = vadd.f32 %v404_v34, %v356_v33  ;;  %v317_v36 = vpop.f32.mrb[1].mxu1 }
 0x233   :  { %v318_v37 = vadd.f32 %v356_v33, %v317_v36 }
 0x234   :  { %327 = vst [vmem:[#allocation12 + $0x8] sm:$0xff] %v323_v35 }
 0x235   :  { %326 = vst [vmem:[#allocation12] sm:$0xff] %v318_v37 }
 0x236   :  { %557 = shalt.err (!%p554_p2)
}
 0x237   :  { %s558_s11 = scalar_lea.hbm %s717_s5, 256 }
 0x238   :  { %p559_p3 = scmp.ne.s32.totalorder %s717_s5, %s558_s11  ;;  %p562_p4 = scmp.lt.u32.totalorder %s558_s11, %s717_s5 }
 0x23a   :  { %p564_p5 = pnand %p562_p4, %p559_p3 }
 0x23c   :  { %567 = shalt.err (!%p564_p5)
}
 0x23d   :  { %339 = dma.vmem_to_hbm [thread:$0]  %s334_s3, 256, %s717_s5, [#allocation5], %s581_s18, %s581_s18, %s582_s19  }
 0x23e   :  { %574 = dma.done.wait [#allocation5], 256  }
 0x23f   :  { %575 = vsyncadd [#allocation5], 4294967040 }
 0x240   :  { %343 = vsyncpa [#allocation4], 1 }
 0x241   :  { %344 = vsyncpa [#allocation7], 1 }
 0x242   :  { %345 = vsyncpa [#allocation10], 1 }
 0x243   :  { %346 = vsyncpa [#allocation5], 1 }

</bundles_post_ra>
